<compile_context>
chip_gen: v5e
topology: v5e:2x2
jax: 0.10.0
libtpu: 0.0.40
codegen_flags: <defaults>
</compile_context>

<pallas_src>
import functools

import jax
import jax.numpy as jnp
from jax.experimental import pallas as pl
from jax.experimental.pallas import tpu as pltpu

_NEG_LARGE = -1e30  # bias for padded vocab columns (exp underflows to exactly 0)


def _round_up(x, m):
    return ((x + m - 1) // m) * m


def _cdiv(a, b):
    return (a + b - 1) // b


@functools.lru_cache(maxsize=1)
def _tpu_params():
    """Return (vmem_capacity_bytes, mxu_width, num_tensorcores) with fallbacks."""
    kind = ""
    try:
        kind = jax.devices()[0].device_kind.lower()
    except Exception:
        pass
    if "v5" in kind and ("lite" in kind or "v5e" in kind):
        vmem, mxu, cores = 128 * 2**20, 128, 1            # v5e
    elif "v4" in kind or "v5" in kind:
        vmem, mxu, cores = 128 * 2**20, 128, 2            # v4 / v5p (megacore)
    elif "v6" in kind:
        vmem, mxu, cores = 128 * 2**20, 256, 1            # v6e
    elif "v7" in kind or "7x" in kind:
        vmem, mxu, cores = 64 * 2**20, 256, 2             # v7x: 64 MiB VMEM / TC
    else:
        vmem, mxu, cores = 64 * 2**20, 128, 1             # unknown: conservative
    try:  # prefer the runtime's own VMEM capacity when queryable
        cap = getattr(pltpu.get_tpu_info(), "vmem_capacity_bytes", None)
        if cap:
            vmem = int(cap)
    except Exception:
        pass
    return vmem, mxu, cores


def prepare_generator_params(w, b, operand_dtype=jnp.bfloat16):
    """One-time parameter prep (do this OUTSIDE the per-call hot path).

    w: (d_model, vocab) = torch weight.T ; b: (vocab,)
    Casts the weight to the MXU operand dtype (bf16 default: the kernel is
    HBM-bound on the weight stream, so halving its bytes ~2x's throughput) and,
    only if vocab is not already a multiple of 128, pads the vocab axis once
    (padded bias columns get -1e30 so they never perturb the softmax).
    Returns (w_prepared, bias_prepared(1, Vp) f32, original_vocab_size).
    """
    D, V = w.shape
    b = b.astype(jnp.float32)
    Vp = _round_up(V, 128)
    if Vp != V:
        w = jnp.pad(w, ((0, 0), (0, Vp - V)))
        b = jnp.pad(b, ((0, Vp - V),), constant_values=_NEG_LARGE)
    if operand_dtype is not None:
        w = w.astype(operand_dtype)
    return w, b.reshape(1, Vp), V


# --------------------------------------------------------------------------- #
# Kernels
# --------------------------------------------------------------------------- #

def _fused_kernel(x_ref, w_ref, b_ref, o_ref, m_ref, l_ref):
    """Single-pass: logits + online log-softmax, resident (tm, Vp) output block."""
    j = pl.program_id(1)
    nj = pl.num_programs(1)
    tv = w_ref.shape[1]

    @pl.when(j == 0)
    def _init():
        m_ref[...] = jnp.full(m_ref.shape, -jnp.inf, m_ref.dtype)
        l_ref[...] = jnp.zeros(l_ref.shape, l_ref.dtype)

    # MXU matmul with f32 accumulation; all softmax math stays f32.
    logits = jnp.dot(x_ref[...], w_ref[...], preferred_element_type=jnp.float32)
    logits = logits + b_ref[...]                          # (tm, tv) + (1, tv)

    # Online running max / sum-exp across vocab tiles.
    m_prev = m_ref[...]
    m_new = jnp.maximum(m_prev, jnp.max(logits, axis=-1, keepdims=True))
    l_ref[...] = l_ref[...] * jnp.exp(m_prev - m_new) + jnp.sum(
        jnp.exp(logits - m_new), axis=-1, keepdims=True)
    m_ref[...] = m_new

    # Stash the raw logits for this vocab slice in the resident output block.
    col = pl.multiple_of(j * tv, 128)
    o_ref[:, pl.ds(col, tv)] = logits.astype(o_ref.dtype)

    # Rescale epilogue: normalize the whole row-tile once the vocab sweep ends.
    @pl.when(j == nj - 1)
    def _finalize():
        lse = m_ref[...] + jnp.log(l_ref[...])            # (tm, 1)
        o_ref[...] = o_ref[...] - lse.astype(o_ref.dtype)


def _lse_kernel(x_ref, w_ref, b_ref, lse_ref, m_ref, l_ref):
    """Two-pass, pass 1: per-row logsumexp (online over vocab tiles)."""
    j = pl.program_id(1)
    nj = pl.num_programs(1)

    @pl.when(j == 0)
    def _init():
        m_ref[...] = jnp.full(m_ref.shape, -jnp.inf, m_ref.dtype)
        l_ref[...] = jnp.zeros(l_ref.shape, l_ref.dtype)

    logits = jnp.dot(x_ref[...], w_ref[...], preferred_element_type=jnp.float32)
    logits = logits + b_ref[...]

    m_prev = m_ref[...]
    m_new = jnp.maximum(m_prev, jnp.max(logits, axis=-1, keepdims=True))
    l_ref[...] = l_ref[...] * jnp.exp(m_prev - m_new) + jnp.sum(
        jnp.exp(logits - m_new), axis=-1, keepdims=True)
    m_ref[...] = m_new

    @pl.when(j == nj - 1)
    def _finalize():
        lse_ref[...] = m_ref[...] + jnp.log(l_ref[...])


def _normalize_kernel(x_ref, w_ref, b_ref, lse_ref, o_ref):
    """Two-pass, pass 2: log_probs = (x @ w + b) - lse, lane-dense (i,j) stores."""
    logits = jnp.dot(x_ref[...], w_ref[...], preferred_element_type=jnp.float32)
    o_ref[...] = (logits + b_ref[...] - lse_ref[...]).astype(o_ref.dtype)


# --------------------------------------------------------------------------- #
# Wrapper
# --------------------------------------------------------------------------- #

def generator_forward(x, w, b, vocab_size=None, *, tm=None, tv=None, two_pass=None):
    """log_softmax(x @ w + b, axis=-1).

    x: (..., D) float; w: (D, Vp); b: (Vp,) or (1, Vp); returns (..., vocab) f32.
    For the fast path pass w/b through prepare_generator_params() once (bf16
    weights, vocab padded to a 128 multiple). Raw f32 params are also accepted
    and prepared on the fly (keeps their dtype).
    """
    *lead, D = x.shape

    # Accept raw (unprepared) parameters for convenience.
    if b.ndim == 1 or w.shape[1] % 128 != 0:
        w, b, v_raw = prepare_generator_params(w, b, operand_dtype=None)
        if vocab_size is None:
            vocab_size = v_raw
    Vp = w.shape[1]
    V = Vp if vocab_size is None else int(vocab_size)
    b = b.astype(jnp.float32)

    M = 1
    for s in lead:
        M *= int(s)
    M = max(M, 1)

    op_dtype = w.dtype
    op_bytes = jnp.dtype(op_dtype).itemsize
    pack = max(8, 32 // op_bytes)            # sublane packing: f32->8, bf16->16, 8-bit->32

    vmem_cap, mxu, cores = _tpu_params()

    # ---- row tile: match MXU width (256 on v6e/v7x when M allows, else 128) ----
    if tm is None:
        tm = 256 if (mxu >= 256 and M >= 256) else 128
    tm = _round_up(tm, pack)
    tm_eff = max(pack, min(tm, _round_up(M, pack)))
    if cores >= 2 and M > pack:
        # Megacore: make sure every TensorCore gets at least one row tile.
        tm_eff = min(tm_eff, max(pack, _round_up(_cdiv(M, cores), pack)))
    # TODO(synk): for decode-sized M (<= pack) on multi-core chips, split the vocab
    # axis across cores with per-core partial (m, l) stats and a tiny combine.

    # ---- vocab tile: lane-dense multiple of 128 that divides Vp ----
    if tv is None:
        tv = 2048 if vmem_cap >= 96 * 2**20 else 1024
    tv_eff = min(_round_up(tv, 128), Vp)
    while Vp % tv_eff != 0:
        tv_eff -= 128
    tv_eff = max(tv_eff, 128)
    # Keep the double-buffered (D, tv) weight slab within a fraction of VMEM.
    while tv_eff > 128 and 2 * D * tv_eff * op_bytes > vmem_cap // 3:
        tv_eff -= 128
        while Vp % tv_eff != 0:
            tv_eff -= 128

    n_row_tiles = _cdiv(M, tm_eff)
    grid = (n_row_tiles, Vp // tv_eff)

    # ---- VMEM footprints & variant selection ----
    x_tile_bytes = 2 * tm_eff * D * op_bytes
    weight_bytes = 2 * D * tv_eff * op_bytes
    bias_bytes = 2 * tv_eff * 4
    stats_bytes = 2 * 2 * tm_eff * 4
    fused_vmem = x_tile_bytes + weight_bytes + bias_bytes + 2 * tm_eff * Vp * 4 + stats_bytes
    if two_pass is None:
        two_pass = fused_vmem > (vmem_cap * 7) // 10

    hard_cap = (vmem_cap * 13) // 16         # leave headroom for compiler scratch

    x2 = x.reshape(M, D).astype(op_dtype)

    if not two_pass:
        vmem_limit = int(min(max(fused_vmem + (2 << 20), 16 << 20), hard_cap))
        cost = pl.CostEstimate(
            flops=2 * M * D * Vp,
            transcendentals=M * Vp,
            bytes_accessed=(M * D * op_bytes
                            + n_row_tiles * (D * Vp * op_bytes + Vp * 4)
                            + M * Vp * 4),
        )
        out = pl.pallas_call(
            _fused_kernel,
            out_shape=jax.ShapeDtypeStruct((M, Vp), jnp.float32),
            grid_spec=pltpu.PrefetchScalarGridSpec(
                num_scalar_prefetch=0,
                grid=grid,
                in_specs=[
                    pl.BlockSpec((tm_eff, D), lambda i, j: (i, 0)),    # x row tile
                    pl.BlockSpec((D, tv_eff), lambda i, j: (0, j)),    # weight slab
                    pl.BlockSpec((1, tv_eff), lambda i, j: (0, j)),    # bias slice
                ],
                out_specs=pl.BlockSpec((tm_eff, Vp), lambda i, j: (i, 0)),
                scratch_shapes=[pltpu.VMEM((tm_eff, 1), jnp.float32),  # running max
                                pltpu.VMEM((tm_eff, 1), jnp.float32)], # running sum-exp
            ),
            compiler_params=pltpu.CompilerParams(
                dimension_semantics=("parallel", "arbitrary"),
                vmem_limit_bytes=vmem_limit,
            ),
            cost_estimate=cost,
        )(x2, w, b)
    else:
        lse_vmem = x_tile_bytes + weight_bytes + bias_bytes + 2 * tm_eff * 4 + stats_bytes
        norm_vmem = (x_tile_bytes + weight_bytes + bias_bytes + 2 * tm_eff * 4
                     + 2 * tm_eff * tv_eff * 4)
        vmem_limit = int(min(max(max(lse_vmem, norm_vmem) + (2 << 20), 16 << 20), hard_cap))

        lse_cost = pl.CostEstimate(
            flops=2 * M * D * Vp,
            transcendentals=M * Vp,
            bytes_accessed=(M * D * op_bytes
                            + n_row_tiles * (D * Vp * op_bytes + Vp * 4) + M * 4),
        )
        lse = pl.pallas_call(
            _lse_kernel,
            out_shape=jax.ShapeDtypeStruct((M, 1), jnp.float32),
            grid_spec=pltpu.PrefetchScalarGridSpec(
                num_scalar_prefetch=0,
                grid=grid,
                in_specs=[
                    pl.BlockSpec((tm_eff, D), lambda i, j: (i, 0)),
                    pl.BlockSpec((D, tv_eff), lambda i, j: (0, j)),
                    pl.BlockSpec((1, tv_eff), lambda i, j: (0, j)),
                ],
                out_specs=pl.BlockSpec((tm_eff, 1), lambda i, j: (i, 0)),
                scratch_shapes=[pltpu.VMEM((tm_eff, 1), jnp.float32),
                                pltpu.VMEM((tm_eff, 1), jnp.float32)],
            ),
            compiler_params=pltpu.CompilerParams(
                dimension_semantics=("parallel", "arbitrary"),
                vmem_limit_bytes=vmem_limit,
            ),
            cost_estimate=lse_cost,
        )(x2, w, b)

        norm_cost = pl.CostEstimate(
            flops=2 * M * D * Vp,
            transcendentals=0,
            bytes_accessed=(M * D * op_bytes
                            + n_row_tiles * (D * Vp * op_bytes + Vp * 4)
                            + M * 4 + M * Vp * 4),
        )
        out = pl.pallas_call(
            _normalize_kernel,
            out_shape=jax.ShapeDtypeStruct((M, Vp), jnp.float32),
            grid_spec=pltpu.PrefetchScalarGridSpec(
                num_scalar_prefetch=0,
                grid=grid,
                in_specs=[
                    pl.BlockSpec((tm_eff, D), lambda i, j: (i, 0)),
                    pl.BlockSpec((D, tv_eff), lambda i, j: (0, j)),
                    pl.BlockSpec((1, tv_eff), lambda i, j: (0, j)),
                    pl.BlockSpec((tm_eff, 1), lambda i, j: (i, 0)),    # lse per row
                ],
                out_specs=pl.BlockSpec((tm_eff, tv_eff), lambda i, j: (i, j)),
            ),
            compiler_params=pltpu.CompilerParams(
                dimension_semantics=("parallel", "parallel"),
                vmem_limit_bytes=vmem_limit,
            ),
            cost_estimate=norm_cost,
        )(x2, w, b, lse)

    if V != Vp:
        out = out[:, :V]
    return out.reshape(*lead, V)


if __name__ == "__main__":
    # Small shapes consistent with the module: d_model=64, vocab=380, batch=2, seq=9
    # (odd seq / non-128-multiple vocab exercise the padding + multi-tile paths).
    B, S, D, V = 2, 9, 64, 380

    key = jax.random.PRNGKey(0)
    kx, kw, kb = jax.random.split(key, 3)

    x = jax.random.normal(kx, (B, S, D), dtype=jnp.float32)
    # Linear params (PyTorch stores weight (V, D); we keep (D, V) = weight.T).
    bound = 1.0 / (D ** 0.5)
    w = jax.random.uniform(kw, (D, V), minval=-bound, maxval=bound, dtype=jnp.float32)
    b = jax.random.uniform(kb, (V,), minval=-bound, maxval=bound, dtype=jnp.float32)

    ref = jax.nn.log_softmax(x.reshape(-1, D) @ w + b, axis=-1).reshape(B, S, V)

    # 1) f32 single-pass fused path (tv=128 forces a multi-tile online softmax sweep).
    out = jax.block_until_ready(generator_forward(x, w, b, tv=128))
    assert out.shape == (B, S, V)
    assert jnp.allclose(out, ref, atol=2e-5, rtol=2e-5), \
        float(jnp.max(jnp.abs(out - ref)))

    # 2) f32 two-pass fallback path (the v7x / large-vocab layout), forced here.
    out_2p = jax.block_until_ready(generator_forward(x, w, b, tv=128, two_pass=True))
    assert jnp.allclose(out_2p, ref, atol=2e-5, rtol=2e-5), \
        float(jnp.max(jnp.abs(out_2p - ref)))

    # 3) bf16-weight MXU fast path: params cast/padded ONCE outside the hot path.
    w_bf16, b_prep, v_orig = prepare_generator_params(w, b)       # bf16 default
    out_bf16 = jax.block_until_ready(
        generator_forward(x, w_bf16, b_prep, v_orig, tv=128))
    assert out_bf16.shape == (B, S, V)
    assert jnp.allclose(out_bf16, ref, atol=5e-2, rtol=0), \
        float(jnp.max(jnp.abs(out_bf16 - ref)))

    print("KERNEL_OK")
</pallas_src>

<mosaic_0001>
module attributes {stable_mosaic.version = 11 : i64} {
  func.func @_fused_kernel(%arg0: i32, %arg1: i32, %arg2: memref<24x64xf32, #tpu.memory_space<vmem>>, %arg3: memref<64x128xf32, #tpu.memory_space<vmem>>, %arg4: memref<1x128xf32, #tpu.memory_space<vmem>>, %arg5: memref<24x384xf32, #tpu.memory_space<vmem>>, %arg6: memref<24x1xf32, #tpu.memory_space<vmem>>, %arg7: memref<24x1xf32, #tpu.memory_space<vmem>>) attributes {dimension_semantics = [#tpu.dimension_semantics<parallel>, #tpu.dimension_semantics<arbitrary>], iteration_bounds = array<i64: 1, 3>, scalar_prefetch = 0 : i64, scratch_operands = 2 : i64, tpu.core_type = #tpu.core_type<tc>, window_params = [{transform_indices = @transform_0, window_bounds = array<i64: 24, 64>}, {transform_indices = @transform_1, window_bounds = array<i64: 64, 128>}, {transform_indices = @transform_2, window_bounds = array<i64: 1, 128>}, {transform_indices = @transform_3, window_bounds = array<i64: 24, 384>}]} {
    %c0_i32 = arith.constant 0 : i32
    %0 = arith.cmpi eq, %arg1, %c0_i32 : i32
    %1 = arith.extui %0 : i1 to i32
    %c0_i32_0 = arith.constant 0 : i32
    %2 = arith.cmpi ne, %1, %c0_i32_0 : i32
    scf.if %2 {
      %cst_18 = arith.constant 0xFF800000 : f32
      %32 = vector.broadcast %cst_18 : f32 to vector<24x1xf32>
      %c0_19 = arith.constant 0 : index
      %c0_20 = arith.constant 0 : index
      %33 = vector.load %arg6[%c0_19, %c0_20] : memref<24x1xf32, #tpu.memory_space<vmem>>, vector<24x1xf32>
      tpu.vector_store %arg6[%c0_19, %c0_20], %32 {strides = array<i32>} : memref<24x1xf32, #tpu.memory_space<vmem>>, vector<24x1xf32>,
      %cst_21 = arith.constant 0.000000e+00 : f32
      %34 = vector.broadcast %cst_21 : f32 to vector<24x1xf32>
      %c0_22 = arith.constant 0 : index
      %c0_23 = arith.constant 0 : index
      %35 = vector.load %arg7[%c0_22, %c0_23] : memref<24x1xf32, #tpu.memory_space<vmem>>, vector<24x1xf32>
      tpu.vector_store %arg7[%c0_22, %c0_23], %34 {strides = array<i32>} : memref<24x1xf32, #tpu.memory_space<vmem>>, vector<24x1xf32>,
    } else {
    }
    %c0 = arith.constant 0 : index
    %c0_1 = arith.constant 0 : index
    %3 = vector.load %arg2[%c0, %c0_1] : memref<24x64xf32, #tpu.memory_space<vmem>>, vector<24x64xf32>
    %c0_2 = arith.constant 0 : index
    %c0_3 = arith.constant 0 : index
    %4 = vector.load %arg3[%c0_2, %c0_3] : memref<64x128xf32, #tpu.memory_space<vmem>>, vector<64x128xf32>
    %cst = arith.constant dense<0.000000e+00> : vector<24x128xf32>
    %5 = tpu.matmul %3, %4, %cst {dimension_numbers = #tpu.dot_dimension_numbers<[1], [0], [0], [1], [0, 0, 1, 1], [], []>} : vector<24x64xf32>, vector<64x128xf32>, vector<24x128xf32> -> vector<24x128xf32>
    %c0_4 = arith.constant 0 : index
    %c0_5 = arith.constant 0 : index
    %6 = vector.load %arg4[%c0_4, %c0_5] : memref<1x128xf32, #tpu.memory_space<vmem>>, vector<1x128xf32>
    %7 = vector.broadcast %6 : vector<1x128xf32> to vector<24x128xf32>
    %8 = arith.addf %5, %7 : vector<24x128xf32>
    %c0_6 = arith.constant 0 : index
    %c0_7 = arith.constant 0 : index
    %9 = vector.load %arg6[%c0_6, %c0_7] : memref<24x1xf32, #tpu.memory_space<vmem>>, vector<24x1xf32>
    %cst_8 = arith.constant dense<0xFF800000> : vector<24xf32>
    %10 = vector.multi_reduction <maximumf>, %8, %cst_8 [1] : vector<24x128xf32> to vector<24xf32>
    %11 = vector.shape_cast %10 : vector<24xf32> to vector<24x1xf32>
    %12 = arith.maximumf %9, %11 : vector<24x1xf32>
    %c0_9 = arith.constant 0 : index
    %c0_10 = arith.constant 0 : index
    %13 = vector.load %arg7[%c0_9, %c0_10] : memref<24x1xf32, #tpu.memory_space<vmem>>, vector<24x1xf32>
    %14 = arith.subf %9, %12 : vector<24x1xf32>
    %15 = math.exp %14 : vector<24x1xf32>
    %16 = arith.mulf %13, %15 : vector<24x1xf32>
    %17 = vector.broadcast %12 : vector<24x1xf32> to vector<24x128xf32>
    %18 = arith.subf %8, %17 : vector<24x128xf32>
    %19 = math.exp %18 : vector<24x128xf32>
    %cst_11 = arith.constant dense<0.000000e+00> : vector<24xf32>
    %20 = vector.multi_reduction <add>, %19, %cst_11 [1] : vector<24x128xf32> to vector<24xf32>
    %21 = vector.shape_cast %20 : vector<24xf32> to vector<24x1xf32>
    %22 = arith.addf %16, %21 : vector<24x1xf32>
    %c0_12 = arith.constant 0 : index
    %c0_13 = arith.constant 0 : index
    %23 = vector.load %arg7[%c0_12, %c0_13] : memref<24x1xf32, #tpu.memory_space<vmem>>, vector<24x1xf32>
    tpu.vector_store %arg7[%c0_12, %c0_13], %22 {strides = array<i32>} : memref<24x1xf32, #tpu.memory_space<vmem>>, vector<24x1xf32>,
    %c0_14 = arith.constant 0 : index
    %c0_15 = arith.constant 0 : index
    %24 = vector.load %arg6[%c0_14, %c0_15] : memref<24x1xf32, #tpu.memory_space<vmem>>, vector<24x1xf32>
    tpu.vector_store %arg6[%c0_14, %c0_15], %12 {strides = array<i32>} : memref<24x1xf32, #tpu.memory_space<vmem>>, vector<24x1xf32>,
    %c128_i32 = arith.constant 128 : i32
    %25 = arith.muli %arg1, %c128_i32 : i32
    %26 = tpu.assume_multiple %25, 128 : i32
    %c0_16 = arith.constant 0 : index
    %27 = arith.index_cast %26 : i32 to index
    %28 = vector.load %arg5[%c0_16, %27] : memref<24x384xf32, #tpu.memory_space<vmem>>, vector<24x128xf32>
    tpu.vector_store %arg5[%c0_16, %27], %8 {strides = array<i32>} : memref<24x384xf32, #tpu.memory_space<vmem>>, vector<24x128xf32>,
    %c2_i32 = arith.constant 2 : i32
    %29 = arith.cmpi eq, %arg1, %c2_i32 : i32
    %30 = arith.extui %29 : i1 to i32
    %c0_i32_17 = arith.constant 0 : i32
    %31 = arith.cmpi ne, %30, %c0_i32_17 : i32
    scf.if %31 {
      %c0_18 = arith.constant 0 : index
      %c0_19 = arith.constant 0 : index
      %32 = vector.load %arg6[%c0_18, %c0_19] : memref<24x1xf32, #tpu.memory_space<vmem>>, vector<24x1xf32>
      %c0_20 = arith.constant 0 : index
      %c0_21 = arith.constant 0 : index
      %33 = vector.load %arg7[%c0_20, %c0_21] : memref<24x1xf32, #tpu.memory_space<vmem>>, vector<24x1xf32>
      %34 = math.log %33 : vector<24x1xf32>
      %35 = arith.addf %32, %34 : vector<24x1xf32>
      %c0_22 = arith.constant 0 : index
      %c0_23 = arith.constant 0 : index
      %36 = vector.load %arg5[%c0_22, %c0_23] : memref<24x384xf32, #tpu.memory_space<vmem>>, vector<24x384xf32>
      %37 = vector.broadcast %35 : vector<24x1xf32> to vector<24x384xf32>
      %38 = arith.subf %36, %37 : vector<24x384xf32>
      %c0_24 = arith.constant 0 : index
      %c0_25 = arith.constant 0 : index
      %39 = vector.load %arg5[%c0_24, %c0_25] : memref<24x384xf32, #tpu.memory_space<vmem>>, vector<24x384xf32>
      tpu.vector_store %arg5[%c0_24, %c0_25], %38 {strides = array<i32>} : memref<24x384xf32, #tpu.memory_space<vmem>>, vector<24x384xf32>,
    } else {
    }
    return
  }
  func.func @transform_0(%arg0: i32, %arg1: i32) -> (i32, i32) {
    %c0_i32 = arith.constant 0 : i32
    %c0_i32_0 = arith.constant 0 : i32
    return %arg0, %c0_i32 : i32, i32
  }
  func.func @transform_1(%arg0: i32, %arg1: i32) -> (i32, i32) {
    %c0_i32 = arith.constant 0 : i32
    %c0_i32_0 = arith.constant 0 : i32
    return %c0_i32, %arg1 : i32, i32
  }
  func.func @transform_2(%arg0: i32, %arg1: i32) -> (i32, i32) {
    %c0_i32 = arith.constant 0 : i32
    %c0_i32_0 = arith.constant 0 : i32
    return %c0_i32, %arg1 : i32, i32
  }
  func.func @transform_3(%arg0: i32, %arg1: i32) -> (i32, i32) {
    %c0_i32 = arith.constant 0 : i32
    %c0_i32_0 = arith.constant 0 : i32
    return %arg0, %c0_i32 : i32, i32
  }
}

</mosaic_0001>

<bundles_post_ra>
// kernel: tpu_custom_call.1
= control target key start
LH: loop header
LB: loop body
LE: loop exit
PB: predicated region body
PF: predicated region fallthrough
CT: control target
= control target key end

     0   :  { %8 = vsyncpa [#allocation5], 0  ;;  %s1072_s0 = inlined_call_operand.hbm [shape: f32[18,64], index: 0, kind: input, shape index: {}]   ;;  %s1073_s1 = inlined_call_operand.hbm [shape: f32[64,384], index: 1, kind: input, shape index: {}]   ;;  %s1074_s2 = inlined_call_operand.hbm [shape: f32[1,384], index: 2, kind: input, shape index: {}]   ;;  %s1075_s3 = inlined_call_operand.hbm [shape: f32[18,384], index: 3, kind: output, shape index: {}]  }
   0x1   :  { %9 = vsyncpa [#allocation8], 0 }
   0x2   :  { %11 = vsyncpa [#allocation8 + $0x1], 0 }
   0x3   :  { %12 = vsyncpa [#allocation6], 0  ;;  %s916_s12 = smov 0   ;;  %s918_s13 = smov 0  }
   0x4   :  { %s920_s14 = smov 0   ;;  %s922_s15 = smov 0  }
   0x5   :  { %s924_s16 = smov 0   ;;  %s926_s17 = smov 0  }
   0x6 LB: > { %s27_s18 = sadd.s32 1, %s879_s16  ;;  %s63_s19 = sadd.s32 1, %s871_s14  ;;  %s883_s17 = sphi %s926_s17, %s18_s17   ;;  %s879_s16 = sphi %s924_s16, %s1084_s16   ;;  %s875_s15 = sphi %s922_s15, %s1083_s15   ;;  %s871_s14 = sphi %s920_s14, %s1082_s14   ;;  %s867_s13 = sphi %s918_s13, %s1081_s13   ;;  %s863_s12 = sphi %s916_s12, %s1080_s12  }
   0x7   : > { %p28_p0 = scmp.ge.s32.totalorder %s27_s18, 3  ;;  %p70_p1 = scmp.ne.s32.totalorder %s871_s14, %s867_s13 }
   0x8   : > { %p71_p2 = scmp.eq.s32.totalorder %s883_s17, 0  ;;  %p620_p5 = scmp.lt.s32.totalorder %s883_s17, 3 }
   0x9   : > { %s1086_s18 = smov (%p28_p0, %s27_s18), 0  ;;  %s169_s22 = sand.u32 1, %s883_s17  }
   0xa   : > { %p953_p3 = por %p71_p2, %p70_p1  ;;  %s60_s21 = ssub.s32 %s879_s16, %s1086_s18 }
   0xb   : > { %p61_p4 = scmp.eq.s32.totalorder %s60_s21, 0  ;;  %s171_s23 = sand.u32 1, %s871_s14  }
   0xc   : > { %s564_s25 = sshll.u32 %s171_s23, 6  ;;  %s565_s26 = sshll.u32 %s879_s16, 3 }
   0xd   : > { %s963_s24 = scalar_select %p61_p4, %s871_s14, %s63_s19  }
   0xe   : > { %s177_s29 = scalar_lea.hbm %s1073_s1, %s565_s26  ;;  %s173_s30 = scalar_lea.vmem [#allocation7], %s564_s25 }
   0xf   : > { %s180_s4 = sshll.u32 %s173_s30, 4  ;;  %s178_s5 = sshll.u32 %s177_s29, 4  ;;  %s181_s4 = int_to_ptr.vmem [resolvable:$true] %s180_s4  ;;  %s179_s5 = int_to_ptr.hbm [resolvable:$true] %s178_s5 }
  0x10   : > { %p973_p6 = pnand %p620_p5, %p953_p3  ;;  %s977_s7 = scalar_lea.sflag [#allocation8], %s169_s22 }
  0x11   : > { %s885_s8 = smov 384   ;;  %s886_s9 = smov 128  }
  0x12   : > { %s887_s10 = smov 8   ;;  %s983_s11 = sadd.s32 4294967295, %s883_s17  }
  0x13   : > { %615 = dma.hbm_to_vmem [thread:$0]  (!%p973_p6), %s179_s5, 1024, %s181_s4, %s977_s7, %s885_s8, %s886_s9, %s887_s10  }
  0x14   : > { %p76_p7 = scmp.ne.s32.totalorder %s867_s13, %s863_s12  ;;  %p77_p8 = scmp.eq.s32.totalorder %s983_s11, 0 }
  0x15   : > { %p561_p9 = scmp.ge.s32.totalorder %s883_s17, 1  ;;  %p139_p10 = scmp.lt.s32.totalorder %s883_s17, 4 }
  0x16   : > { %p992_p11 = por %p77_p8, %p76_p7  ;;  %s153_s22 = sshll.u32 %s1072_s0, 4  ;;  %s154_s22 = int_to_ptr.hbm [resolvable:$true] %s153_s22 }
  0x17   : > { %p999_p12 = pnand %p561_p9, %p139_p10  ;;  %s888_s12 = smov [#allocation4]  }
  0x18   : > { %s155_s26 = sshll.u32 %s888_s12, 4  ;;  %s196_s29 = scalar_lea.hbm %s1074_s2, %s879_s16  ;;  %s156_s26 = int_to_ptr.vmem [resolvable:$true] %s155_s26 }
  0x19   : > { %p608_p13 = pneg %p999_p12  ;;  %s198_s30 = sshll.u32 %s196_s29, 4  ;;  %s199_s30 = int_to_ptr.hbm [resolvable:$true] %s198_s30 }
  0x1a   : > { %s193_s4 = scalar_lea.vmem [#allocation9], %s171_s23  ;;  %209 = sbr.rel (%p999_p12) target bundleno = 712 (0x2c8), region = 32 }
  0x1b   : > { %p609_p0 = pnand %p608_p13, %p77_p8  ;;  %s200_s5 = sshll.u32 %s193_s4, 4  ;;  %s201_s5 = int_to_ptr.vmem [resolvable:$true] %s200_s5 }
  0x1c   : > { %618 = dma.hbm_to_vmem [thread:$0]  (!%p973_p6), %s199_s30, 16, %s201_s5, %s977_s7  }
  0x1d   : > { %611 = dma.hbm_to_vmem [thread:$0]  (!%p609_p0), %s154_s22, 384, %s156_s26, [#allocation5], %s886_s9, %s886_s9, %s887_s10  }
  0x1f   : > { %850 = dma.done.wait (%p77_p8), [#allocation5], 384  }
  0x20   : > { %852 = vsyncadd (%p77_p8), [#allocation5], 4294966912  ;;  %s216_s8 = sand.u32 1, %s983_s11   ;;  %s218_s20 = sand.u32 1, %s867_s13  }
  0x21   : > { %s568_s23 = sshll.u32 %s218_s20, 6  ;;  %s217_s21 = scalar_lea.sflag [#allocation8], %s216_s8 }
  0x22   : > { %s1024_s12 = scalar_lea.vmem [#allocation7], %s568_s23 }
  0x23   : > { %854 = dma.done.wait (%p992_p11), %s217_s21, 1040  }
  0x24   : > { %856 = vsyncadd (%p992_p11), %s217_s21, 4294966256  ;;  %s1030_s6 = scalar_lea.vmem [#allocation9], %s218_s20  ;;  %p569_p1 = scmp.ne.s32.totalorder %s875_s15, 0 }
  0x26   : > { %257 = sbr.rel (%p569_p1) target bundleno = 50 (0x32), region = 48 }
  0x2b   : > { %vm258_vm0 = vcmask 7168   ;;  %v889_v0 = vmov -inf   ;;  %v890_v1 = vmov 0.0  }
  0x2c   : > { %259 = vst.msk [vmem:[#allocation2] sm:$0xff] %vm258_vm0, %v889_v0 }
  0x2d   : > { %260 = vst.msk [vmem:[#allocation2 + $0x8] sm:$0xff] %vm258_vm0, %v889_v0 }
  0x2e   : > { %261 = vst.msk [vmem:[#allocation2 + $0x10] sm:$0xff] %vm258_vm0, %v889_v0 }
  0x2f   : > { %262 = vst.msk [vmem:[#allocation3] sm:$0xff] %vm258_vm0, %v890_v1 }
  0x30   : > { %263 = vst.msk [vmem:[#allocation3 + $0x8] sm:$0xff] %vm258_vm0, %v890_v1 }
  0x31   : > { %264 = vst.msk [vmem:[#allocation3 + $0x10] sm:$0xff] %vm258_vm0, %v890_v1 }
  0x32 PF: > { %v275_v2 = vld [vmem:[%s1024_s12 + $0x38] sm:$0xff]  ;;  %v274_v3 = vld [vmem:[%s1024_s12 + $0x30] sm:$0xff]  ;;  %v273_v4 = vld [vmem:[%s1024_s12 + $0x28] sm:$0xff]  ;;  %vm280_vm1 = vcmask 523264   ;;  %s573_s7 = sshll.u32 %s875_s15, 7  ;;  %v891_v20 = vmov 0  }
  0x33   : > { %298 = vmatpush.msra.mxu0 %v275_v2  ;;  %580 = vmatpush.msra.mxu1 %v275_v2  ;;  %v272_v5 = vld [vmem:[%s1024_s12 + $0x20] sm:$0xff]  ;;  %v271_v6 = vld [vmem:[%s1024_s12 + $0x18] sm:$0xff]  ;;  %v270_v7 = vld [vmem:[%s1024_s12 + $0x10] sm:$0xff]  ;;  %s384_s9 = sshra.s32 %s573_s7, 7  ;;  %vm376_vm2 = vcmask 7168   ;;  %p575_p2 = scmp.ne.s32.totalorder %s875_s15, 2 }
  0x34   : > { %581 = vmatpush.msra.mxu2 %v275_v2  ;;  %v269_v8 = vld [vmem:[%s1024_s12 + $0x8] sm:$0xff]  ;;  %v268_v9 = vld [vmem:[%s1024_s12] sm:$0xff]  ;;  %v266_v11 = vld [vmem:[#allocation4 + $0x8] sm:$0xff]  ;;  %s574_s10 = sshll.u32 %s384_s9, 3  ;;  %683 = vset.pattern.permute.xlu1 %v891_v20 }
  0x35   : > { %299 = vmatpush.msra.mxu0 %v274_v3  ;;  %582 = vmatpush.msra.mxu1 %v274_v3  ;;  %v265_v10 = vld [vmem:[#allocation4] sm:$0xff]  ;;  %v267_v12 = vld [vmem:[#allocation4 + $0x10] sm:$0xff]  ;;  %s387_s19 = scalar_lea.vmem [#allocation10], %s574_s10  ;;  %v317_v25 = vld [vmem:[#allocation2 + $0x8] sm:$0xff] }
  0x36   : > { %583 = vmatpush.msra.mxu2 %v274_v3  ;;  %v686_v13 = vld [vmem:[%s1030_s6] ss:$0 sm:$0xff]  ;;  %684 = vset.pattern.permute.xlu2 %v891_v20  ;;  %v318_v26 = vld [vmem:[#allocation2 + $0x10] sm:$0xff]  ;;  %v328_v54 = vld [vmem:[#allocation3] sm:$0xff] }
  0x37   : > { %300 = vmatpush.msra.mxu0 %v273_v4  ;;  %584 = vmatpush.msra.mxu1 %v273_v4  ;;  %v316_v21 = vld [vmem:[#allocation2] sm:$0xff] }
  0x38   : > { %585 = vmatpush.msra.mxu2 %v273_v4  ;;  %685 = vset.pattern.permute.xlu0 %v891_v20  ;;  %v329_v47 = vld [vmem:[#allocation3 + $0x8] sm:$0xff]  ;;  %v330_v59 = vld [vmem:[#allocation3 + $0x10] sm:$0xff] }
  0x39   : > { %301 = vmatpush.msra.mxu0 %v272_v5  ;;  %586 = vmatpush.msra.mxu1 %v272_v5 }
  0x3a   : > { %587 = vmatpush.msra.mxu2 %v272_v5 }
  0x3b   : > { %302 = vmatpush.msra.mxu0 %v271_v6  ;;  %588 = vmatpush.msra.mxu1 %v271_v6 }
  0x3c   : > { %589 = vmatpush.msra.mxu2 %v271_v6 }
  0x3d   : > { %303 = vmatpush.msra.mxu0 %v270_v7  ;;  %590 = vmatpush.msra.mxu1 %v270_v7 }
  0x3e   : > { %591 = vmatpush.msra.mxu2 %v270_v7 }
  0x3f   : > { %304 = vmatpush.msra.mxu0 %v269_v8  ;;  %592 = vmatpush.msra.mxu1 %v269_v8 }
  0x40   : > { %593 = vmatpush.msra.mxu2 %v269_v8 }
  0x41   : > { %305 = vmatpush.msra.mxu0 %v268_v9  ;;  %594 = vmatpush.msra.mxu1 %v268_v9 }
  0x42   : > { %570 = vmatmul.msk.f32.vlgmr.msra.gmra.mxu0 %vm280_vm1, %v265_v10  ;;  %571 = vmatmul.msk.f32.vlgmr.msra.gmra.mxu1 %vm280_vm1, %v266_v11 }
  0x43   : > { %595 = vmatpush.msra.mxu2 %v268_v9 }
  0x44   : > { %572 = vmatmul.msk.f32.vlgmr.msra.gmra.mxu2 %vm280_vm1, %v267_v12 }
  0xbf   : > { %v307_v14 = vpop.f32.mrf.mxu0  ;;  %v310_v15 = vpop.f32.mrf.mxu1 }
  0xc0   : > { %v308_v16 = vadd.f32 %v686_v13, %v307_v14  ;;  %v311_v17 = vadd.f32 %v686_v13, %v310_v15 }
  0xc2   : > { %388 = vst [vmem:[%s387_s19] sm:$0xff] %v308_v16  ;;  %319 = vmax.xlane.f32.xlu0 %v308_v16 }
  0xc3   : > { %389 = vst [vmem:[%s387_s19 + $0x18] sm:$0xff] %v311_v17 }
  0xc7   : > { %v313_v18 = vpop.f32.mrf.mxu2 }
  0xc8   : > { %v314_v19 = vadd.f32 %v686_v13, %v313_v18 }
  0xca   : > { %321 = vmax.xlane.f32.xlu0 %v311_v17  ;;  %390 = vst [vmem:[%s387_s19 + $0x30] sm:$0xff] %v314_v19  ;;  %323 = vmax.xlane.f32.xlu1 %v314_v19 }
 0x135   : > { %v320_v22 = vpop.xlane.xlu0 %319 }
 0x136   : > { %v325_v23 = vmax.f32 %v316_v21, %v320_v22 }
 0x138   : > { %v331_v24 = vsub.f32 %v316_v21, %v325_v23  ;;  %380 = vst.msk [vmem:[#allocation2] sm:$0xff] %vm376_vm2, %v325_v23  ;;  %345 = vperm.xlu1 %683, %v325_v23  }
 0x13a   : > { %v334_v51 = vmul.f32 1.442695, %v331_v24 }
 0x13d   : > { %v322_v27 = vpop.xlane.xlu0 %321  ;;  %v324_v28 = vpop.xlane.xlu1 %323 }
 0x13e   : > { %v326_v29 = vmax.f32 %v317_v25, %v322_v27  ;;  %v327_v30 = vmax.f32 %v318_v26, %v324_v28 }
 0x140   : > { %v332_v31 = vsub.f32 %v317_v25, %v326_v29  ;;  %381 = vst.msk [vmem:[#allocation2 + $0x8] sm:$0xff] %vm376_vm2, %v326_v29  ;;  %350 = vperm.xlu2 %684, %v326_v29   ;;  %v333_v32 = vsub.f32 %v318_v26, %v327_v30 }
 0x141   : > { %382 = vst.msk [vmem:[#allocation2 + $0x10] sm:$0xff] %vm376_vm2, %v327_v30 }
 0x142   : > { %v336_v45 = vmul.f32 1.442695, %v332_v31  ;;  %v338_v52 = vmul.f32 1.442695, %v333_v32 }
 0x148   : > { %355 = vperm.xlu2 %684, %v327_v30  }
 0x19a   : > { %v351_v33 = vpop.permute.xlu2 %350 }
 0x19b   : > { %v359_v34 = vsub.f32 %v311_v17, %v351_v33 }
 0x19d   : > { %v363_v35 = vmul.f32 1.442695, %v359_v34 }
 0x19f   : > { %687 = vpow2.f32 %v363_v35 }
 0x1a2   : > { %v356_v39 = vpop.permute.xlu2 %355 }
 0x1a3   : > { %v360_v41 = vsub.f32 %v314_v19, %v356_v39 }
 0x1a5   : > { %v688_v36 = vpop.eup %687  ;;  %v365_v42 = vmul.f32 1.442695, %v360_v41 }
 0x1a6   : > { %369 = vadd.xlane.f32.xlu2 %v688_v36 }
 0x1aa   : > { %v346_v37 = vpop.permute.xlu1 %345 }
 0x1ab   : > { %v358_v38 = vsub.f32 %v308_v16, %v346_v37 }
 0x1ad   : > { %v361_v40 = vmul.f32 1.442695, %v358_v38 }
 0x1af   : > { %689 = vpow2.f32 %v361_v40 }
 0x1b0   : > { %691 = vpow2.f32 %v365_v42 }
 0x1b1   : > { %693 = vpow2.f32 %v336_v45 }
 0x1b2   : > { %695 = vpow2.f32 %v334_v51 }
 0x1b3   : > { %697 = vpow2.f32 %v338_v52 }
 0x1b5   : > { %v690_v43 = vpop.eup %689 }
 0x1b6   : > { %367 = vadd.xlane.f32.xlu0 %v690_v43  ;;  %v692_v44 = vpop.eup %691 }
 0x1b7   : > { %v694_v46 = vpop.eup %693 }
 0x1b8   : > { %v341_v48 = vmul.f32 %v694_v46, %v329_v47  ;;  %v696_v53 = vpop.eup %695 }
 0x1b9   : > { %v340_v55 = vmul.f32 %v696_v53, %v328_v54  ;;  %v698_v58 = vpop.eup %697 }
 0x1ba   : > { %v342_v60 = vmul.f32 %v698_v58, %v330_v59 }
 0x1be   : > { %371 = vadd.xlane.f32.xlu0 %v692_v44 }
 0x219   : > { %v370_v49 = vpop.xlane.xlu2 %369 }
 0x21a   : > { %v374_v50 = vadd.f32 %v370_v49, %v341_v48 }
 0x21c   : > { %378 = vst.msk [vmem:[#allocation3 + $0x8] sm:$0xff] %vm376_vm2, %v374_v50 }
 0x229   : > { %v368_v56 = vpop.xlane.xlu0 %367 }
 0x22a   : > { %v373_v57 = vadd.f32 %v368_v56, %v340_v55 }
 0x22c   : > { %377 = vst.msk [vmem:[#allocation3] sm:$0xff] %vm376_vm2, %v373_v57 }
 0x230   : > { %394 = sbr.rel (%p575_p2) target bundleno = 706 (0x2c2), region = 52 }
 0x231   : > { %v372_v61 = vpop.xlane.xlu0 %371 }
 0x232   : > { %v375_v62 = vadd.f32 %v372_v61, %v342_v60 }
 0x234   : > { %379 = vst.msk [vmem:[#allocation3 + $0x10] sm:$0xff] %vm376_vm2, %v375_v62 }
 0x235   : > { %v398_v63 = vld [vmem:[#allocation3] sm:$0xff]  ;;  %v892_v0 = vmov 0   ;;  %v399_v2 = vld [vmem:[#allocation3 + $0x8] sm:$0xff]  ;;  %v397_v7 = vld [vmem:[#allocation2 + $0x10] sm:$0xff] }
 0x236   : > { %699 = vset.pattern.permute.xlu0 %v892_v0  ;;  %701 = vlog2.f32 %v398_v63  ;;  %700 = vset.pattern.permute.xlu1 %v892_v0  ;;  %v395_v4 = vld [vmem:[#allocation2] sm:$0xff]  ;;  %v396_v13 = vld [vmem:[#allocation2 + $0x8] sm:$0xff]  ;;  %v411_v16 = vld [vmem:[#allocation10 + $0x8] sm:$0xff] }
 0x237   : > { %v410_v15 = vld [vmem:[#allocation10] sm:$0xff]  ;;  %v412_v17 = vld [vmem:[#allocation10 + $0x10] sm:$0xff]  ;;  %v417_v20 = vld [vmem:[#allocation10 + $0x38] sm:$0xff] }
 0x238   : > { %v416_v18 = vld [vmem:[#allocation10 + $0x30] sm:$0xff]  ;;  %v418_v24 = vld [vmem:[#allocation10 + $0x40] sm:$0xff]  ;;  %v413_v29 = vld [vmem:[#allocation10 + $0x18] sm:$0xff] }
 0x239   : > { %v414_v30 = vld [vmem:[#allocation10 + $0x20] sm:$0xff]  ;;  %v415_v31 = vld [vmem:[#allocation10 + $0x28] sm:$0xff] }
 0x23b   : > { %v400_v1 = vld [vmem:[#allocation3 + $0x10] sm:$0xff] }
 0x23c   : > { %703 = vlog2.f32 %v400_v1  ;;  %v702_v3 = vpop.eup %701 }
 0x23d   : > { %705 = vlog2.f32 %v399_v2  ;;  %v402_v6 = vmul.f32 0.6931472, %v702_v3 }
 0x23f   : > { %v407_v10 = vadd.f32 %v402_v6, %v395_v4 }
 0x241   : > { %421 = vperm.xlu0 %699, %v407_v10  }
 0x242   : > { %v704_v5 = vpop.eup %703 }
 0x243   : > { %v706_v8 = vpop.eup %705  ;;  %v406_v9 = vmul.f32 0.6931472, %v704_v5 }
 0x244   : > { %v404_v12 = vmul.f32 0.6931472, %v706_v8 }
 0x245   : > { %v409_v11 = vadd.f32 %v406_v9, %v397_v7 }
 0x246   : > { %v408_v14 = vadd.f32 %v404_v12, %v396_v13 }
 0x247   : > { %431 = vperm.xlu1 %700, %v409_v11  }
 0x249   : > { %426 = vperm.xlu0 %699, %v408_v14  }
 0x2b3   : > { %v422_v19 = vpop.permute.xlu0 %421 }
 0x2b4   : > { %v434_v21 = vsub.f32 %v410_v15, %v422_v19  ;;  %v435_v22 = vsub.f32 %v411_v16, %v422_v19  ;;  %v436_v23 = vsub.f32 %v412_v17, %v422_v19 }
 0x2b6   : > { %443 = vst [vmem:[#allocation10] sm:$0xff] %v434_v21 }
 0x2b7   : > { %444 = vst [vmem:[#allocation10 + $0x8] sm:$0xff] %v435_v22 }
 0x2b8   : > { %445 = vst [vmem:[#allocation10 + $0x10] sm:$0xff] %v436_v23 }
 0x2b9   : > { %v432_v25 = vpop.permute.xlu1 %431 }
 0x2ba   : > { %v440_v26 = vsub.f32 %v416_v18, %v432_v25  ;;  %v441_v27 = vsub.f32 %v417_v20, %v432_v25  ;;  %v442_v28 = vsub.f32 %v418_v24, %v432_v25 }
 0x2bb   : > { %v427_v32 = vpop.permute.xlu0 %426 }
 0x2bc   : > { %449 = vst [vmem:[#allocation10 + $0x30] sm:$0xff] %v440_v26  ;;  %v437_v33 = vsub.f32 %v413_v29, %v427_v32  ;;  %v438_v34 = vsub.f32 %v414_v30, %v427_v32  ;;  %v439_v35 = vsub.f32 %v415_v31, %v427_v32 }
 0x2bd   : > { %450 = vst [vmem:[#allocation10 + $0x38] sm:$0xff] %v441_v27 }
 0x2be   : > { %451 = vst [vmem:[#allocation10 + $0x40] sm:$0xff] %v442_v28 }
 0x2bf   : > { %446 = vst [vmem:[#allocation10 + $0x18] sm:$0xff] %v437_v33 }
 0x2c0   : > { %447 = vst [vmem:[#allocation10 + $0x20] sm:$0xff] %v438_v34 }
 0x2c1   : > { %448 = vst [vmem:[#allocation10 + $0x28] sm:$0xff] %v439_v35 }
 0x2c2 PF: > { %p622_p3 = scmp.eq.s32.totalorder %s983_s11, 2  ;;  %s463_s25 = sshll.u32 %s1075_s3, 4  ;;  %s464_s25 = int_to_ptr.hbm [resolvable:$true] %s463_s25 }
 0x2c3   : > { %s893_s26 = smov [#allocation10]   ;;  %s894_s28 = smov 384  }
 0x2c4   : > { %s461_s27 = sshll.u32 %s893_s26, 4  ;;  %s895_s29 = smov 24   ;;  %s462_s27 = int_to_ptr.vmem [resolvable:$true] %s461_s27 }
 0x2c5   : > { %605 = dma.vmem_to_hbm [thread:$0]  (%p622_p3), %s462_s27, 1152, %s464_s25, [#allocation6], %s894_s28, %s894_s28, %s895_s29  }
 0x2c6   : > { %858 = dma.done.wait (%p622_p3), [#allocation6], 1152  }
 0x2c7   : > { %860 = vsyncadd (%p622_p3), [#allocation6], 4294966144 }
 0x2c8 PF: > { %s18_s17 = sadd.s32 1, %s883_s17   ;;  %s1080_s12 = smov %s867_s13 }
 0x2c9   : > { %p15_p4 = scmp.ge.s32.totalorder %s18_s17, 5   ;;  %s1081_s13 = smov %s871_s14 }
 0x2ca   : > { %s1082_s14 = smov %s963_s24  ;;  %s1083_s15 = smov %s879_s16 }
 0x2cb   : > { %s1084_s16 = smov %s1086_s18  ;;  %17 = sbr.rel (!%p15_p4) target bundleno = 6 (0x6), region = 96 }
 0x2d0   :  { %480 = vsyncpa [#allocation5], 1 }
 0x2d1   :  { %482 = vsyncpa [#allocation5 + $0x1], 1 }
 0x2d2   :  { %483 = vsyncpa [#allocation8], 1 }
 0x2d3   :  { %485 = vsyncpa [#allocation8 + $0x1], 1 }
 0x2d4   :  { %486 = vsyncpa [#allocation6], 1 }
 0x2d5   :  { %488 = vsyncpa [#allocation6 + $0x1], 1 }

</bundles_post_ra>
